<compile_context>
chip_gen: v6e
topology: v6e:2x2x1
jax: 0.10.0
libtpu: 0.0.40
codegen_flags: <defaults>
</compile_context>

<pallas_src>
import jax
import jax.numpy as jnp
from jax import lax
from jax.experimental import pallas as pl
from jax.experimental.pallas import tpu as pltpu

EPS = 1e-7          # matches the module-level `eps` used by KLDiv
LANES = 128
SUBLANES = 8
MAX_TILE_ROWS = 4096   # (4096, 128) f32 tile = 2 MiB -> v7x-safe.
# TODO(synk): on v5e/v6e (128 MiB VMEM) MAX_TILE_ROWS=8192-16384 is worth measuring
# (expected only a few % per the tiling curve); keep the v7x-safe default here.


def _round_up(x, m):
    return (x + m - 1) // m * m


def _make_kcl_kernel(n_rows, n_cols, tile_r, tile_c, mask_rows, mask_cols):
    """Kernel over (tile_r, tile_c) blocks of predict/target; emits one f32 partial sum."""

    def kernel(p_ref, t_ref, o_ref):
        p = p_ref[...].astype(jnp.float32)
        t = t_ref[...].astype(jnp.float32)
        if mask_rows or mask_cols:
            # Ragged boundary blocks: out-of-bounds VMEM contents are undefined,
            # so force (t=0, p=1) there -> contribution is exactly 0.
            mask = None
            if mask_rows:
                row = (lax.broadcasted_iota(jnp.int32, (tile_r, tile_c), 0)
                       + pl.program_id(0) * tile_r)
                mask = row < n_rows
            if mask_cols:
                col = (lax.broadcasted_iota(jnp.int32, (tile_r, tile_c), 1)
                       + pl.program_id(1) * tile_c)
                cmask = col < n_cols
                mask = cmask if mask is None else jnp.logical_and(mask, cmask)
            t = jnp.where(mask, t, 0.0)
            p = jnp.where(mask, p, 1.0)
        # Folded single log (halves EUP transcendentals); exact divide on purpose.
        # Zero-padded targets (repack path) give 0 * log(eps/eps) = 0 exactly.
        o_ref[0, 0] = jnp.sum(t * jnp.log((t + EPS) / (p + EPS)))

    return kernel


def kcl(prob1, prob2, *, max_tile_rows=MAX_TILE_ROWS):
    """prob1 = predict, prob2 = target (both [N, C]). Returns scalar loss (f32)."""
    assert prob1.ndim == 2 and prob1.shape == prob2.shape, "Input dimension must be 2"
    n_batch, n_cls = prob1.shape
    total = n_batch * n_cls

    # ---- choose layout without extra HBM passes whenever possible ----
    if n_cls >= LANES:
        if n_cls % LANES == 0:
            # Free, contiguous reshape to a lane-dense (rows, 128) slab.
            rows = total // LANES
            p2 = prob1.reshape(rows, LANES)
            t2 = prob2.reshape(rows, LANES)
        else:
            # Keep original (N, C) layout; ragged last 128-col block is masked in-kernel.
            p2, t2 = prob1, prob2
    else:
        # C < 128: lanes would be mostly idle -> one cheap repack to lane-dense.
        rows = pl.cdiv(total, LANES)
        pad = rows * LANES - total

        def repack(x):
            x = x.reshape(-1)
            if pad:
                x = jnp.concatenate([x, jnp.zeros((pad,), dtype=x.dtype)])
            return x.reshape(rows, LANES)

        p2, t2 = repack(prob1), repack(prob2)

    R, C = p2.shape
    tile_c = LANES
    num_c = pl.cdiv(C, tile_c)
    mask_cols = (C % tile_c) != 0

    if num_c >= 2:
        # Column tiling already yields >= 2 independent grid cells (v7x dual-TC).
        tile_r = R if R <= max_tile_rows else max_tile_rows
    else:
        # Single column tile: split rows so both v7x TensorCores get work.
        if R <= SUBLANES:
            tile_r = R
        else:
            tile_r = min(max_tile_rows, _round_up(pl.cdiv(R, 2), SUBLANES))
    num_r = pl.cdiv(R, tile_r)
    mask_rows = (R % tile_r) != 0

    cost = pl.CostEstimate(
        flops=5 * total,
        transcendentals=total,                      # single folded log per element
        bytes_accessed=(p2.dtype.itemsize + t2.dtype.itemsize) * R * C
        + 4 * num_r * num_c,
    )

    kernel = _make_kcl_kernel(R, C, tile_r, tile_c, mask_rows, mask_cols)

    partials = pl.pallas_call(
        kernel,
        out_shape=jax.ShapeDtypeStruct((num_r, num_c), jnp.float32),
        grid=(num_r, num_c),
        in_specs=[
            pl.BlockSpec((tile_r, tile_c), lambda i, j: (i, j)),
            pl.BlockSpec((tile_r, tile_c), lambda i, j: (i, j)),
        ],
        out_specs=pl.BlockSpec(
            (1, 1), lambda i, j: (i, j), memory_space=pltpu.MemorySpace.SMEM
        ),
        compiler_params=pltpu.CompilerParams(
            dimension_semantics=("parallel", "parallel"),   # independent tiles
            vmem_limit_bytes=32 * 1024 * 1024,
        ),
        cost_estimate=cost,
    )(p2, t2)

    # Tiny final reduction (num_r*num_c scalars) + mean over batch rows.
    return jnp.sum(partials) / jnp.float32(n_batch)


def _kcl_ref(prob1, prob2):
    # Pure-JAX reference mirroring the PyTorch module exactly (two logs).
    p = prob1.astype(jnp.float32)
    t = prob2.astype(jnp.float32)
    kld = jnp.sum(t * (jnp.log(t + EPS) - jnp.log(p + EPS)), axis=1)
    return jnp.mean(kld)


if __name__ == "__main__":
    key = jax.random.PRNGKey(0)
    ks = jax.random.split(key, 8)

    def check(p, t, rtol=5e-5, atol=1e-6):
        loss = jax.block_until_ready(kcl(p, t))
        ref = jax.block_until_ready(_kcl_ref(p, t))
        assert jnp.allclose(loss, ref, rtol=rtol, atol=atol), (loss, ref)

    # Case 1: C < 128 -> lane-dense repack fallback, single grid cell.
    p = jax.nn.softmax(jax.random.normal(ks[0], (8, 32), jnp.float32), axis=-1)
    t = jax.nn.softmax(jax.random.normal(ks[1], (8, 32), jnp.float32), axis=-1)
    check(p, t)

    # Case 2: C >= 128, C % 128 != 0 -> no repack, 2-D grid, ragged column block masked.
    p = jax.nn.softmax(jax.random.normal(ks[2], (13, 1000), jnp.float32), axis=-1)
    t = jax.nn.softmax(jax.random.normal(ks[3], (13, 1000), jnp.float32), axis=-1)
    check(p, t)

    # Case 3: C % 128 == 0 -> free flat reshape, bf16 inputs (half HBM bytes), 2 row tiles.
    p = jax.nn.softmax(jax.random.normal(ks[4], (32, 256), jnp.float32), axis=-1).astype(jnp.bfloat16)
    t = jax.nn.softmax(jax.random.normal(ks[5], (32, 256), jnp.float32), axis=-1).astype(jnp.bfloat16)
    check(p, t)

    # Case 4: C < 128 repack with tail pad + ragged last row tile (OOB rows masked).
    p = jax.nn.softmax(jax.random.normal(ks[6], (37, 40), jnp.float32), axis=-1)
    t = jax.nn.softmax(jax.random.normal(ks[7], (37, 40), jnp.float32), axis=-1)
    check(p, t)

    print("KERNEL_OK")
</pallas_src>

<mosaic_0001>
module attributes {stable_mosaic.version = 11 : i64} {
  func.func @kernel(%arg0: i32, %arg1: i32, %arg2: memref<2x128xf32, #tpu.memory_space<vmem>>, %arg3: memref<2x128xf32, #tpu.memory_space<vmem>>, %arg4: memref<1x1xf32, #tpu.memory_space<smem>>) attributes {dimension_semantics = [#tpu.dimension_semantics<parallel>, #tpu.dimension_semantics<parallel>], iteration_bounds = array<i64: 1, 1>, scalar_prefetch = 0 : i64, scratch_operands = 0 : i64, tpu.core_type = #tpu.core_type<tc>, window_params = [{transform_indices = @transform_0, window_bounds = array<i64: 2, 128>}, {transform_indices = @transform_1, window_bounds = array<i64: 2, 128>}, {transform_indices = @transform_2, window_bounds = array<i64: 1, 1>}]} {
    %c0 = arith.constant 0 : index
    %c0_0 = arith.constant 0 : index
    %0 = vector.load %arg2[%c0, %c0_0] : memref<2x128xf32, #tpu.memory_space<vmem>>, vector<2x128xf32>
    %c0_1 = arith.constant 0 : index
    %c0_2 = arith.constant 0 : index
    %1 = vector.load %arg3[%c0_1, %c0_2] : memref<2x128xf32, #tpu.memory_space<vmem>>, vector<2x128xf32>
    %cst = arith.constant 1.000000e-07 : f32
    %2 = vector.broadcast %cst : f32 to vector<2x128xf32>
    %3 = arith.addf %1, %2 : vector<2x128xf32>
    %cst_3 = arith.constant 1.000000e-07 : f32
    %4 = vector.broadcast %cst_3 : f32 to vector<2x128xf32>
    %5 = arith.addf %0, %4 : vector<2x128xf32>
    %6 = arith.divf %3, %5 : vector<2x128xf32>
    %7 = math.log %6 : vector<2x128xf32>
    %8 = arith.mulf %1, %7 : vector<2x128xf32>
    %9 = vector.shape_cast %8 : vector<2x128xf32> to vector<1x2x128xf32>
    %cst_4 = arith.constant dense<0.000000e+00> : vector<1xf32>
    %10 = vector.multi_reduction <add>, %9, %cst_4 [1, 2] : vector<1x2x128xf32> to vector<1xf32>
    %11 = vector.shape_cast %10 : vector<1xf32> to vector<1x1x1xf32>
    %12 = vector.extract %11[0, 0, 0] : f32 from vector<1x1x1xf32>
    %c0_5 = arith.constant 0 : index
    %c0_6 = arith.constant 0 : index
    %13 = memref.load %arg4[%c0_5, %c0_6] : memref<1x1xf32, #tpu.memory_space<smem>>
    memref.store %12, %arg4[%c0_5, %c0_6] : memref<1x1xf32, #tpu.memory_space<smem>>
    return
  }
  func.func @transform_0(%arg0: i32, %arg1: i32) -> (i32, i32) {
    %c0_i32 = arith.constant 0 : i32
    return %arg0, %arg1 : i32, i32
  }
  func.func @transform_1(%arg0: i32, %arg1: i32) -> (i32, i32) {
    %c0_i32 = arith.constant 0 : i32
    return %arg0, %arg1 : i32, i32
  }
  func.func @transform_2(%arg0: i32, %arg1: i32) -> (i32, i32) {
    %c0_i32 = arith.constant 0 : i32
    return %arg0, %arg1 : i32, i32
  }
}

</mosaic_0001>

<bundles_post_ra>
// kernel: tpu_custom_call.1
= control target key start
LH: loop header
LB: loop body
LE: loop exit
PB: predicated region body
PF: predicated region fallthrough
CT: control target
= control target key end

     0   :  { %7 = vsyncpa [#allocation3], 0  ;;  %s163_s0 = inlined_call_operand.hbm [shape: f32[2,128], index: 0, kind: input, shape index: {}]   ;;  %s164_s1 = inlined_call_operand.hbm [shape: f32[2,128], index: 1, kind: input, shape index: {}]   ;;  %s165_s2 = inlined_call_operand.hbm [shape: f32[1,1], index: 2, kind: output, shape index: {}]  }
   0x1   :  { %8 = vsyncpa [#allocation6], 0 }
   0x2   :  { %9 = vsyncpa [#allocation4], 0  ;;  %s136_s9 = smov [#allocation2]   ;;  %s137_s11 = smov [#allocation5]  }
   0x3   :  { %s16_s10 = sshll.u32 %s136_s9, 4  ;;  %s26_s12 = sshll.u32 %s137_s11, 4  ;;  %s17_s10 = int_to_ptr.vmem [resolvable:$true] %s16_s10  ;;  %s27_s12 = int_to_ptr.vmem [resolvable:$true] %s26_s12 }
   0x4   :  { %s90_s13 = scalar_lea.vmem %s17_s10, 32  ;;  %p95_p1 = scmp.lt.s32.totalorder %s17_s10, %s17_s10 }
   0x5   :  { %p91_p0 = scmp.ne.s32.totalorder %s17_s10, %s90_s13  ;;  %p96_p2 = scmp.lt.s32.totalorder %s90_s13, %s90_s13 }
   0x7   :  { %p97_p3 = por %p96_p2, %p95_p1 }
   0x9   :  { %p98_p4 = pnand %p97_p3, %p91_p0 }
   0xb   :  { %101 = shalt.err (!%p98_p4)
}
   0xc   :  { %19 = dma.hbm_to_vmem [thread:$0]  %s163_s0, 32, %s17_s10, [#allocation3]  }
   0xd   :  { %s110_s16 = scalar_lea.vmem %s27_s12, 32  ;;  %p115_p6 = scmp.lt.s32.totalorder %s27_s12, %s27_s12 }
   0xe   :  { %p111_p5 = scmp.ne.s32.totalorder %s27_s12, %s110_s16  ;;  %p116_p7 = scmp.lt.s32.totalorder %s110_s16, %s110_s16 }
  0x10   :  { %p117_p8 = por %p116_p7, %p115_p6 }
  0x12   :  { %p118_p9 = pnand %p117_p8, %p111_p5 }
  0x14   :  { %121 = shalt.err (!%p118_p9)
}
  0x15   :  { %29 = dma.hbm_to_vmem [thread:$0]  %s164_s1, 32, %s27_s12, [#allocation6]  }
  0x16   :  { %130 = dma.done.wait [#allocation3], 32  }
  0x17   :  { %131 = vsyncadd [#allocation3], 4294967264 }
  0x18   :  { %132 = dma.done.wait [#allocation6], 32  }
  0x19   :  { %133 = vsyncadd [#allocation6], 4294967264  ;;  %v36_v0 = vld [vmem:[#allocation2] sm:$0x3]  ;;  %v37_v2 = vld [vmem:[#allocation5] sm:$0x3] }
  0x1a   :  { %v39_v1 = vadd.f32 1e-07, %v36_v0  ;;  %v38_v3 = vadd.f32 1e-07, %v37_v2  ;;  %vm45_vm0 = vcmask 1041408   ;;  %s138_s1 = smov [#allocation7]  }
  0x1c   :  { %78 = vrcp.f32 %v39_v1 }
  0x29   :  { %v79_v4 = vpop.eup %78 }
  0x2a   :  { %v41_v5 = vmul.f32 %v79_v4, %v38_v3 }
  0x2c   :  { %80 = vlog2.f32 %v41_v5 }
  0x39   :  { %v81_v6 = vpop.eup %80 }
  0x3a   :  { %v43_v7 = vmul.f32 0.6931472, %v81_v6 }
  0x3c   :  { %v44_v8 = vmul.f32 %v43_v7, %v37_v2 }
  0x3e   :  { %v46_v9 = vsel %vm45_vm0, %v44_v8, 0.0 }
  0x3f   :  { %47 = vadd.xlane.f32.xlu0 %v46_v9 }
  0xc8   :  { %v48_v10 = vpop.xlane.xlu0 %47 }
  0xc9   :  { %v49_v11 = vrot.slane %v48_v10, 4 }
  0xcb   :  { %v50_v12 = vadd.f32 %v49_v11, %v48_v10 }
  0xcd   :  { %v51_v13 = vrot.slane %v50_v12, 2 }
  0xcf   :  { %v52_v14 = vadd.f32 %v51_v13, %v50_v12 }
  0xd1   :  { %v53_v15 = vrot.slane %v52_v14, 1 }
  0xd3   :  { %v54_v16 = vadd.f32 %v53_v15, %v52_v14 }
  0xd5   :  { %73 = vpush %v54_v16 }
 0x106   :  { %s74_s0 = spop %73 }
 0x107   :  { %57 = sst [smem:[#allocation7]] %s74_s0 }
 0x108   :  { %65 = dma.smem_to_hbm %s138_s1, 16, %s165_s2, [#allocation4]  }
 0x109   :  { %134 = dma.done.wait [#allocation4], 16  }
 0x10a   :  { %135 = vsyncadd [#allocation4], 4294967280 }
 0x10b   :  { %69 = sfence }
 0x10c   :  { %70 = vsyncpa [#allocation3], 1 }
 0x10d   :  { %71 = vsyncpa [#allocation6], 1 }
 0x10e   :  { %72 = vsyncpa [#allocation4], 1 }

</bundles_post_ra>
